<compile_context>
chip_gen: v6e
topology: v6e:2x2x1
jax: 0.10.0
libtpu: 0.0.40
codegen_flags: <defaults>
</compile_context>

<pallas_src>
import numpy as np
import jax
import jax.numpy as jnp
from jax.experimental import pallas as pl
from jax.experimental.pallas import tpu as pltpu


def _copy_kernel(x_ref, o_ref):
    # Pure copy of one (bn, bc) tile. No reshape, no cross-lane work.
    o_ref[...] = x_ref[...]


_LANE = 128
# One tile (input or output) ~4 MiB -> in+out double-buffered ~16 MiB, well
# under the 32 MiB scoped-VMEM limit requested below on all generations
# (v5e/v6e: 128 MiB physical VMEM; v7x: 64 MiB, so 32 MiB leaves half free).
_TILE_BYTES = 4 << 20
_VMEM_LIMIT_BYTES = 32 << 20


def _sublane(dtype):
    # Packed-sublane count: 8 for 4-byte, 16 for 2-byte, 32 for 1-byte dtypes.
    return {4: 8, 2: 16, 1: 32}.get(jnp.dtype(dtype).itemsize, 8)


def _choose_slab(n, d, total):
    """Pick a 2-D slab view (R, C) of the flat data, lane-dense when possible."""
    for c in (4096, 2048, 1024, 512, 256, 128):
        if total % c == 0:
            return total // c, c
    # total not divisible by 128: fall back to the logical view; edge columns
    # get masked stores (correct, just below roofline for awkward shapes).
    return n, d


def _choose_blocks(R, C, dtype):
    sub = _sublane(dtype)
    itemsize = jnp.dtype(dtype).itemsize

    # Lane (last-dim) block: multiple of 128 when possible, else full extent.
    bc = min(2048, (C // _LANE) * _LANE) if C >= _LANE else C

    # Sublane (row) block: size the tile to ~_TILE_BYTES, multiple of `sub`.
    bn = max(sub, (_TILE_BYTES // max(1, bc * itemsize)) // sub * sub)
    if R <= bn:
        bn = R  # full-extent rows: single row-block, always legal

    # v7x megacore: if everything collapsed to one block, split the row axis
    # so both TensorCores receive work (harmless no-op effect on v5e/v6e).
    if pl.cdiv(R, bn) * pl.cdiv(C, bc) == 1 and R >= 2 * sub:
        bn = pl.cdiv(pl.cdiv(R, 2), sub) * sub

    return bn, bc


def flatten(x, *, donate_input=False):
    """Pallas equivalent of Flatten.forward: (N, ...) -> (N, prod(rest)).

    NOTE: absent a kernel mandate, `jnp.reshape(x, (n, -1))` alone is optimal
    (metadata-only). This runs the required physical copy at HBM roofline.
    """
    n = x.shape[0]
    d = int(np.prod(x.shape[1:])) if x.ndim > 1 else 1
    total = n * d

    # Free, view-only reshape to a lane-dense slab (or the logical view).
    R, C = _choose_slab(n, d, total)
    x2d = jnp.reshape(x, (R, C))

    bn, bc = _choose_blocks(R, C, x.dtype)
    grid = (pl.cdiv(R, bn), pl.cdiv(C, bc))

    out2d = pl.pallas_call(
        _copy_kernel,
        out_shape=jax.ShapeDtypeStruct((R, C), x.dtype),
        grid=grid,
        in_specs=[pl.BlockSpec((bn, bc), lambda i, j: (i, j))],
        out_specs=pl.BlockSpec((bn, bc), lambda i, j: (i, j)),
        compiler_params=pltpu.CompilerParams(
            dimension_semantics=("parallel", "parallel"),
            vmem_limit_bytes=_VMEM_LIMIT_BYTES,
        ),
        input_output_aliases={0: 0} if donate_input else {},
    )(x2d)

    # Free, view-only reshape back to the logical (N, prod(rest)) shape.
    return jnp.reshape(out2d, (n, d))


if __name__ == "__main__":
    key = jax.random.PRNGKey(0)

    # Small NCHW input consistent with a conv feature map: batch=2, C=4, 16x16.
    x = jax.random.normal(key, (2, 4, 16, 16), dtype=jnp.float32)
    out = jax.block_until_ready(flatten(x))
    ref = jnp.reshape(x, (x.shape[0], -1))
    assert out.shape == (2, 4 * 16 * 16), out.shape
    assert out.dtype == x.dtype
    np.testing.assert_array_equal(np.asarray(out), np.asarray(ref))

    # Robustness check: trailing size not a multiple of 128 (masked edge path).
    x2 = jax.random.normal(jax.random.PRNGKey(1), (3, 867), dtype=jnp.float32)
    out2 = jax.block_until_ready(flatten(x2))
    np.testing.assert_array_equal(np.asarray(out2),
                                  np.asarray(jnp.reshape(x2, (3, -1))))

    print("KERNEL_OK")
</pallas_src>

<mosaic_0001>
module attributes {stable_mosaic.version = 11 : i64} {
  func.func @_copy_kernel(%arg0: i32, %arg1: i32, %arg2: memref<1x2048xf32, #tpu.memory_space<vmem>>, %arg3: memref<1x2048xf32, #tpu.memory_space<vmem>>) attributes {dimension_semantics = [#tpu.dimension_semantics<parallel>, #tpu.dimension_semantics<parallel>], iteration_bounds = array<i64: 1, 1>, scalar_prefetch = 0 : i64, scratch_operands = 0 : i64, tpu.core_type = #tpu.core_type<tc>, window_params = [{transform_indices = @transform_0, window_bounds = array<i64: 1, 2048>}, {transform_indices = @transform_1, window_bounds = array<i64: 1, 2048>}]} {
    %c0 = arith.constant 0 : index
    %c0_0 = arith.constant 0 : index
    %0 = vector.load %arg2[%c0, %c0_0] : memref<1x2048xf32, #tpu.memory_space<vmem>>, vector<1x2048xf32>
    %c0_1 = arith.constant 0 : index
    %c0_2 = arith.constant 0 : index
    %1 = vector.load %arg3[%c0_1, %c0_2] : memref<1x2048xf32, #tpu.memory_space<vmem>>, vector<1x2048xf32>
    tpu.vector_store %arg3[%c0_1, %c0_2], %0 {strides = array<i32>} : memref<1x2048xf32, #tpu.memory_space<vmem>>, vector<1x2048xf32>,
    return
  }
  func.func @transform_0(%arg0: i32, %arg1: i32) -> (i32, i32) {
    %c0_i32 = arith.constant 0 : i32
    return %arg0, %arg1 : i32, i32
  }
  func.func @transform_1(%arg0: i32, %arg1: i32) -> (i32, i32) {
    %c0_i32 = arith.constant 0 : i32
    return %arg0, %arg1 : i32, i32
  }
}

</mosaic_0001>

<bundles_post_ra>
// kernel: tpu_custom_call.1
= control target key start
LH: loop header
LB: loop body
LE: loop exit
PB: predicated region body
PF: predicated region fallthrough
CT: control target
= control target key end

     0   :  { %6 = vsyncpa [#allocation3], 0  ;;  %s104_s0 = inlined_call_operand.hbm [shape: f32[1,2048], index: 0, kind: input, shape index: {}]   ;;  %s105_s1 = inlined_call_operand.hbm [shape: f32[1,2048], index: 1, kind: output, shape index: {}]  }
   0x1   :  { %7 = vsyncpa [#allocation4], 0  ;;  %s86_s6 = smov [#allocation2]  }
   0x2   :  { %s14_s7 = sshll.u32 %s86_s6, 4  ;;  %s15_s7 = int_to_ptr.vmem [resolvable:$true] %s14_s7 }
   0x3   :  { %s50_s8 = scalar_lea.vmem %s15_s7, 256  ;;  %p55_p1 = scmp.lt.s32.totalorder %s15_s7, %s15_s7 }
   0x4   :  { %p51_p0 = scmp.ne.s32.totalorder %s15_s7, %s50_s8  ;;  %p56_p2 = scmp.lt.s32.totalorder %s50_s8, %s50_s8 }
   0x6   :  { %p57_p3 = por %p56_p2, %p55_p1 }
   0x8   :  { %p58_p4 = pnand %p57_p3, %p51_p0 }
   0xa   :  { %61 = shalt.err (!%p58_p4)
}
   0xb   :  { %17 = dma.hbm_to_vmem [thread:$0]  %s104_s0, 256, %s15_s7, [#allocation3]  }
   0xc   :  { %82 = dma.done.wait [#allocation3], 256  }
   0xd   :  { %83 = vsyncadd [#allocation3], 4294967040  ;;  %s87_s11 = smov [#allocation5]   ;;  %v21_v0 = vld [vmem:[#allocation2] sm:$0xff]  ;;  %v22_v1 = vld [vmem:[#allocation2 + $0x8] sm:$0xff] }
   0xe   :  { %s31_s12 = sshll.u32 %s87_s11, 4  ;;  %23 = vst [vmem:[#allocation5] sm:$0xff] %v21_v0  ;;  %24 = vst [vmem:[#allocation5 + $0x8] sm:$0xff] %v22_v1  ;;  %s32_s12 = int_to_ptr.vmem [resolvable:$true] %s31_s12 }
   0xf   :  { %s62_s13 = scalar_lea.vmem %s32_s12, 256  ;;  %p67_p6 = scmp.lt.s32.totalorder %s32_s12, %s32_s12 }
  0x10   :  { %p63_p5 = scmp.ne.s32.totalorder %s32_s12, %s62_s13  ;;  %p68_p7 = scmp.lt.s32.totalorder %s62_s13, %s62_s13 }
  0x12   :  { %p69_p8 = por %p68_p7, %p67_p6 }
  0x14   :  { %p70_p9 = pnand %p69_p8, %p63_p5 }
  0x16   :  { %73 = shalt.err (!%p70_p9)
}
  0x17   :  { %34 = dma.vmem_to_hbm [thread:$0]  %s32_s12, 256, %s105_s1, [#allocation4]  }
  0x18   :  { %84 = dma.done.wait [#allocation4], 256  }
  0x19   :  { %85 = vsyncadd [#allocation4], 4294967040 }
  0x1a   :  { %38 = vsyncpa [#allocation3], 1 }
  0x1b   :  { %39 = vsyncpa [#allocation4], 1 }

</bundles_post_ra>
